<compile_context>
chip_gen: v6e
topology: v6e:2x2x1
jax: 0.10.0
libtpu: 0.0.40
codegen_flags: <defaults>
</compile_context>

<pallas_src>
import functools

import jax
import jax.numpy as jnp
from jax import lax
from jax.experimental import pallas as pl
from jax.experimental.pallas import tpu as pltpu


def prepare_params(emb_table, w_ih, w_hh, b_ih, b_hh, w_cls, b_cls):
    """Constant-fold weight layout once, outside the runtime path.

    Folds the input projection and RNN bias into the embedding table
    (table_proj = emb @ W_ih^T + b_ih + b_hh — legal because every x_t is
    exactly a table row and the bias is applied unconditionally), then packs
    every constant tensor into ONE f32 slab of width D with 8-row-aligned
    segments:
        rows [0,         vpad)       : table_proj, zero-padded to vpad rows
        rows [vpad,      vpad+D)     : W_hh^T
        rows [vpad+D,    vpad+2D)    : W_cls^T, zero-padded to D columns
        rows [vpad+2D,   vpad+2D+8)  : b_cls in row 0, zero-padded
    """
    V, D = emb_table.shape
    C = w_cls.shape[0]
    assert C <= D, "slab layout assumes num_classes <= hidden dim"
    vpad = -(-V // 8) * 8

    table_proj = emb_table @ w_ih.T + (b_ih + b_hh)[None, :]          # (V, D)
    tproj_pad = jnp.zeros((vpad, D), jnp.float32).at[:V, :].set(table_proj)
    wcls_pad = jnp.zeros((D, D), jnp.float32).at[:, :C].set(w_cls.T)  # (D, D)
    bcls_pad = jnp.zeros((8, D), jnp.float32).at[0, :C].set(b_cls)    # (8, D)
    slab = jnp.concatenate([tproj_pad, w_hh.T, wcls_pad, bcls_pad], axis=0)
    return slab, vpad, C


@functools.partial(jax.jit, static_argnames=("vpad", "num_classes"))
def torch_model_forward(x_ids, slab, *, vpad, num_classes):
    """Equivalent of TorchModel.forward(x) with y=None (inference)."""
    B, S = x_ids.shape
    D = slab.shape[1]
    C = num_classes
    SB = S * B

    # Time-major flat ids (row r = t*B + b); tiny int32 reshape, fused by XLA
    # into the copy feeding the single pallas_call.
    ids_tm = x_ids.T.reshape(SB, 1).astype(jnp.int32)

    def kernel(ids_ref, slab_ref, out_ref):
        # --- Fused one-hot gather + input projection + RNN bias (one MXU op).
        # Token ids are < V <= vpad, so padded table rows never get selected.
        onehot = (ids_ref[...] ==
                  lax.broadcasted_iota(jnp.int32, (SB, vpad), 1)
                  ).astype(jnp.float32)                              # (SB, vpad)
        xw = jnp.dot(onehot, slab_ref[0:vpad, :],
                     preferred_element_type=jnp.float32)             # (SB, D)

        # Loop-invariant recurrent weight, loaded once.
        whh = slab_ref[vpad:vpad + D, :]                             # (D, D)

        # --- Fully unrolled serial recurrence; only h @ W_hh^T + tanh on the
        # critical chain (bias + input projection already folded into xw).
        # TODO(synk): hold W_hh^T stationary in the MXU via
        # pltpu.matmul_push_rhs / matmul_acc_lhs / matmul_pop once the f32
        # 32x32 lowering is validated; kept as jnp.dot for portable lowering.
        h = jnp.zeros((B, D), jnp.float32)
        for t in range(S):
            pre = xw[t * B:(t + 1) * B, :] + jnp.dot(
                h, whh, preferred_element_type=jnp.float32)
            h = jnp.tanh(pre)

        # --- Last-step classifier + softmax (class axis last == PyTorch dim=1).
        wcls = slab_ref[vpad + D:vpad + 2 * D, :]                    # (D, D)
        bcls = slab_ref[vpad + 2 * D:vpad + 2 * D + 1, :]            # (1, D)
        logits = jnp.dot(h, wcls, preferred_element_type=jnp.float32) + bcls

        col = lax.broadcasted_iota(jnp.int32, (B, D), 1)
        logits = jnp.where(col < C, logits, -1e30)   # mask padded class slots
        m = jnp.max(logits, axis=1, keepdims=True)
        e = jnp.exp(logits - m)
        probs = e / jnp.sum(e, axis=1, keepdims=True)
        out_ref[...] = probs[:, :C]

    vmem = pl.BlockSpec(memory_space=pltpu.MemorySpace.VMEM)
    return pl.pallas_call(
        kernel,
        out_shape=jax.ShapeDtypeStruct((B, C), jnp.float32),
        in_specs=[vmem, vmem],
        out_specs=vmem,
    )(ids_tm, slab)


def reference_forward(x_ids, emb_table, w_ih, w_hh, b_ih, b_hh, w_cls, b_cls):
    """Pure-JAX reference mirroring PyTorch nn.RNN / Linear / Softmax."""
    emb = emb_table[x_ids]                      # (B, S, D)
    B, S, D = emb.shape

    def step(h, x_t):
        h_new = jnp.tanh(x_t @ w_ih.T + h @ w_hh.T + b_ih + b_hh)
        return h_new, None

    h_last, _ = lax.scan(step, jnp.zeros((B, D), jnp.float32),
                         jnp.transpose(emb, (1, 0, 2)))
    logits = h_last @ w_cls.T + b_cls
    return jax.nn.softmax(logits, axis=1)


if __name__ == "__main__":
    # Model hyperparameters (small, consistent with the module's __init__).
    vector_dim = 32          # embedding / hidden size
    sentence_length = 8      # sequence length; num classes = 9
    vocab_size = 30
    batch = 2
    num_classes = sentence_length + 1

    key = jax.random.PRNGKey(0)
    k_emb, k_wih, k_whh, k_bih, k_bhh, k_wc, k_bc, k_x = jax.random.split(key, 8)

    # Deterministic parameter init (shapes match nn.Embedding / nn.RNN / nn.Linear).
    emb_table = 0.1 * jax.random.normal(k_emb, (vocab_size, vector_dim), jnp.float32)
    emb_table = emb_table.at[0].set(0.0)  # padding_idx=0
    w_ih = 0.1 * jax.random.normal(k_wih, (vector_dim, vector_dim), jnp.float32)
    w_hh = 0.1 * jax.random.normal(k_whh, (vector_dim, vector_dim), jnp.float32)
    b_ih = 0.1 * jax.random.normal(k_bih, (vector_dim,), jnp.float32)
    b_hh = 0.1 * jax.random.normal(k_bhh, (vector_dim,), jnp.float32)
    w_cls = 0.1 * jax.random.normal(k_wc, (num_classes, vector_dim), jnp.float32)
    b_cls = 0.1 * jax.random.normal(k_bc, (num_classes,), jnp.float32)

    # Example input: token ids (batch, sentence_length), all within vocab.
    x_ids = jax.random.randint(k_x, (batch, sentence_length), 0, vocab_size,
                               dtype=jnp.int32)

    # Constant-fold projection/bias into the table and pack one weight slab
    # (parameter-load time, not on the runtime path).
    slab, vpad, n_cls = prepare_params(emb_table, w_ih, w_hh, b_ih, b_hh,
                                       w_cls, b_cls)

    # TODO(synk): the y-is-not-None branch (CrossEntropyLoss on softmax outputs)
    # is a training-loss path and is not implemented here.
    y_pred = torch_model_forward(x_ids, slab, vpad=vpad, num_classes=n_cls)
    y_pred = jax.block_until_ready(y_pred)

    y_ref = reference_forward(x_ids, emb_table, w_ih, w_hh, b_ih, b_hh,
                              w_cls, b_cls)
    assert y_pred.shape == (batch, num_classes)
    assert jnp.allclose(y_pred, y_ref, atol=1e-5, rtol=1e-5)

    print("KERNEL_OK")
</pallas_src>

<mosaic_0001>
module attributes {stable_mosaic.version = 11 : i64} {
  func.func @kernel(%arg0: memref<16x1xi32, #tpu.memory_space<vmem>>, %arg1: memref<104x32xf32, #tpu.memory_space<vmem>>, %arg2: memref<2x9xf32, #tpu.memory_space<vmem>>) attributes {dimension_semantics = [], scalar_prefetch = 0 : i64, scratch_operands = 0 : i64, tpu.core_type = #tpu.core_type<tc>} {
    %c0 = arith.constant 0 : index
    %c0_0 = arith.constant 0 : index
    %0 = vector.load %arg0[%c0, %c0_0] : memref<16x1xi32, #tpu.memory_space<vmem>>, vector<16x1xi32>
    %1 = tpu.iota {dimensions = array<i32: 1>} : vector<16x32xi32>
    %2 = vector.broadcast %0 : vector<16x1xi32> to vector<16x32xi32>
    %3 = arith.cmpi eq, %2, %1 : vector<16x32xi32>
    %4 = arith.extui %3 : vector<16x32xi1> to vector<16x32xi32>
    %5 = arith.sitofp %4 : vector<16x32xi32> to vector<16x32xf32>
    %c0_1 = arith.constant 0 : index
    %c0_2 = arith.constant 0 : index
    %6 = vector.load %arg1[%c0_1, %c0_2] : memref<104x32xf32, #tpu.memory_space<vmem>>, vector<32x32xf32>
    %cst = arith.constant dense<0.000000e+00> : vector<16x32xf32>
    %7 = tpu.matmul %5, %6, %cst {dimension_numbers = #tpu.dot_dimension_numbers<[1], [0], [0], [1], [0, 0, 1, 1], [], []>} : vector<16x32xf32>, vector<32x32xf32>, vector<16x32xf32> -> vector<16x32xf32>
    %c32 = arith.constant 32 : index
    %c0_3 = arith.constant 0 : index
    %8 = vector.load %arg1[%c32, %c0_3] : memref<104x32xf32, #tpu.memory_space<vmem>>, vector<32x32xf32>
    %cst_4 = arith.constant 0.000000e+00 : f32
    %9 = vector.broadcast %cst_4 : f32 to vector<2x32xf32>
    %10 = vector.extract_strided_slice %7 {offsets = [0, 0], sizes = [2, 32], strides = [1, 1]} : vector<16x32xf32> to vector<2x32xf32>
    %cst_5 = arith.constant dense<0.000000e+00> : vector<2x32xf32>
    %11 = tpu.matmul %9, %8, %cst_5 {dimension_numbers = #tpu.dot_dimension_numbers<[1], [0], [0], [1], [0, 0, 1, 1], [], []>} : vector<2x32xf32>, vector<32x32xf32>, vector<2x32xf32> -> vector<2x32xf32>
    %12 = arith.addf %10, %11 : vector<2x32xf32>
    %13 = math.tanh %12 : vector<2x32xf32>
    %14 = vector.extract_strided_slice %7 {offsets = [2, 0], sizes = [2, 32], strides = [1, 1]} : vector<16x32xf32> to vector<2x32xf32>
    %cst_6 = arith.constant dense<0.000000e+00> : vector<2x32xf32>
    %15 = tpu.matmul %13, %8, %cst_6 {dimension_numbers = #tpu.dot_dimension_numbers<[1], [0], [0], [1], [0, 0, 1, 1], [], []>} : vector<2x32xf32>, vector<32x32xf32>, vector<2x32xf32> -> vector<2x32xf32>
    %16 = arith.addf %14, %15 : vector<2x32xf32>
    %17 = math.tanh %16 : vector<2x32xf32>
    %18 = vector.extract_strided_slice %7 {offsets = [4, 0], sizes = [2, 32], strides = [1, 1]} : vector<16x32xf32> to vector<2x32xf32>
    %cst_7 = arith.constant dense<0.000000e+00> : vector<2x32xf32>
    %19 = tpu.matmul %17, %8, %cst_7 {dimension_numbers = #tpu.dot_dimension_numbers<[1], [0], [0], [1], [0, 0, 1, 1], [], []>} : vector<2x32xf32>, vector<32x32xf32>, vector<2x32xf32> -> vector<2x32xf32>
    %20 = arith.addf %18, %19 : vector<2x32xf32>
    %21 = math.tanh %20 : vector<2x32xf32>
    %22 = vector.extract_strided_slice %7 {offsets = [6, 0], sizes = [2, 32], strides = [1, 1]} : vector<16x32xf32> to vector<2x32xf32>
    %cst_8 = arith.constant dense<0.000000e+00> : vector<2x32xf32>
    %23 = tpu.matmul %21, %8, %cst_8 {dimension_numbers = #tpu.dot_dimension_numbers<[1], [0], [0], [1], [0, 0, 1, 1], [], []>} : vector<2x32xf32>, vector<32x32xf32>, vector<2x32xf32> -> vector<2x32xf32>
    %24 = arith.addf %22, %23 : vector<2x32xf32>
    %25 = math.tanh %24 : vector<2x32xf32>
    %26 = vector.extract_strided_slice %7 {offsets = [8, 0], sizes = [2, 32], strides = [1, 1]} : vector<16x32xf32> to vector<2x32xf32>
    %cst_9 = arith.constant dense<0.000000e+00> : vector<2x32xf32>
    %27 = tpu.matmul %25, %8, %cst_9 {dimension_numbers = #tpu.dot_dimension_numbers<[1], [0], [0], [1], [0, 0, 1, 1], [], []>} : vector<2x32xf32>, vector<32x32xf32>, vector<2x32xf32> -> vector<2x32xf32>
    %28 = arith.addf %26, %27 : vector<2x32xf32>
    %29 = math.tanh %28 : vector<2x32xf32>
    %30 = vector.extract_strided_slice %7 {offsets = [10, 0], sizes = [2, 32], strides = [1, 1]} : vector<16x32xf32> to vector<2x32xf32>
    %cst_10 = arith.constant dense<0.000000e+00> : vector<2x32xf32>
    %31 = tpu.matmul %29, %8, %cst_10 {dimension_numbers = #tpu.dot_dimension_numbers<[1], [0], [0], [1], [0, 0, 1, 1], [], []>} : vector<2x32xf32>, vector<32x32xf32>, vector<2x32xf32> -> vector<2x32xf32>
    %32 = arith.addf %30, %31 : vector<2x32xf32>
    %33 = math.tanh %32 : vector<2x32xf32>
    %34 = vector.extract_strided_slice %7 {offsets = [12, 0], sizes = [2, 32], strides = [1, 1]} : vector<16x32xf32> to vector<2x32xf32>
    %cst_11 = arith.constant dense<0.000000e+00> : vector<2x32xf32>
    %35 = tpu.matmul %33, %8, %cst_11 {dimension_numbers = #tpu.dot_dimension_numbers<[1], [0], [0], [1], [0, 0, 1, 1], [], []>} : vector<2x32xf32>, vector<32x32xf32>, vector<2x32xf32> -> vector<2x32xf32>
    %36 = arith.addf %34, %35 : vector<2x32xf32>
    %37 = math.tanh %36 : vector<2x32xf32>
    %38 = vector.extract_strided_slice %7 {offsets = [14, 0], sizes = [2, 32], strides = [1, 1]} : vector<16x32xf32> to vector<2x32xf32>
    %cst_12 = arith.constant dense<0.000000e+00> : vector<2x32xf32>
    %39 = tpu.matmul %37, %8, %cst_12 {dimension_numbers = #tpu.dot_dimension_numbers<[1], [0], [0], [1], [0, 0, 1, 1], [], []>} : vector<2x32xf32>, vector<32x32xf32>, vector<2x32xf32> -> vector<2x32xf32>
    %40 = arith.addf %38, %39 : vector<2x32xf32>
    %41 = math.tanh %40 : vector<2x32xf32>
    %c64 = arith.constant 64 : index
    %c0_13 = arith.constant 0 : index
    %42 = vector.load %arg1[%c64, %c0_13] : memref<104x32xf32, #tpu.memory_space<vmem>>, vector<32x32xf32>
    %c96 = arith.constant 96 : index
    %c0_14 = arith.constant 0 : index
    %43 = vector.load %arg1[%c96, %c0_14] : memref<104x32xf32, #tpu.memory_space<vmem>>, vector<1x32xf32>
    %cst_15 = arith.constant dense<0.000000e+00> : vector<2x32xf32>
    %44 = tpu.matmul %41, %42, %cst_15 {dimension_numbers = #tpu.dot_dimension_numbers<[1], [0], [0], [1], [0, 0, 1, 1], [], []>} : vector<2x32xf32>, vector<32x32xf32>, vector<2x32xf32> -> vector<2x32xf32>
    %45 = vector.broadcast %43 : vector<1x32xf32> to vector<2x32xf32>
    %46 = arith.addf %44, %45 : vector<2x32xf32>
    %47 = tpu.iota {dimensions = array<i32: 1>} : vector<2x32xi32>
    %c9_i32 = arith.constant 9 : i32
    %48 = vector.broadcast %c9_i32 : i32 to vector<2x32xi32>
    %49 = arith.cmpi slt, %47, %48 : vector<2x32xi32>
    %cst_16 = arith.constant -1.000000e+30 : f32
    %50 = vector.broadcast %cst_16 : f32 to vector<2x32xf32>
    %51 = arith.select %49, %46, %50 : vector<2x32xi1>, vector<2x32xf32>
    %cst_17 = arith.constant dense<0xFF800000> : vector<2xf32>
    %52 = vector.multi_reduction <maximumf>, %51, %cst_17 [1] : vector<2x32xf32> to vector<2xf32>
    %53 = vector.shape_cast %52 : vector<2xf32> to vector<2x1xf32>
    %54 = vector.broadcast %53 : vector<2x1xf32> to vector<2x32xf32>
    %55 = arith.subf %51, %54 : vector<2x32xf32>
    %56 = math.exp %55 : vector<2x32xf32>
    %cst_18 = arith.constant dense<0.000000e+00> : vector<2xf32>
    %57 = vector.multi_reduction <add>, %56, %cst_18 [1] : vector<2x32xf32> to vector<2xf32>
    %58 = vector.shape_cast %57 : vector<2xf32> to vector<2x1xf32>
    %59 = vector.broadcast %58 : vector<2x1xf32> to vector<2x32xf32>
    %60 = arith.divf %56, %59 : vector<2x32xf32>
    %61 = vector.extract_strided_slice %60 {offsets = [0, 0], sizes = [2, 9], strides = [1, 1]} : vector<2x32xf32> to vector<2x9xf32>
    %c0_19 = arith.constant 0 : index
    %c0_20 = arith.constant 0 : index
    %62 = vector.load %arg2[%c0_19, %c0_20] : memref<2x9xf32, #tpu.memory_space<vmem>>, vector<2x9xf32>
    tpu.vector_store %arg2[%c0_19, %c0_20], %61 {strides = array<i32>} : memref<2x9xf32, #tpu.memory_space<vmem>>, vector<2x9xf32>,
    return
  }
}

</mosaic_0001>

<bundles_post_ra>
// kernel: torch_model_forward.1
= control target key start
LH: loop header
LB: loop body
LE: loop exit
PB: predicated region body
PF: predicated region fallthrough
CT: control target
= control target key end

     0   :  { %v1075_v2 = vmov 0   ;;  %v1076_v5 = vmov 0.0   ;;  %s1260_s0 = inlined_call_operand.vmem [shape: s32[16,1], index: 0, kind: input, shape index: {}]   ;;  %s1261_s1 = inlined_call_operand.vmem [shape: f32[104,32], index: 1, kind: input, shape index: {}]   ;;  %s1262_s2 = inlined_call_operand.hbm [shape: f32[2,9], index: 2, kind: output, shape index: {}]  }
   0x1   :  { %v12_v0 = vld [vmem:[%s1260_s0] sm:$0xff]  ;;  %v31_v1 = vld [vmem:[%s1261_s1 + $0x18] sm:$0xff]  ;;  %1032 = vset.pattern.permute.xlu0 %v1075_v2  ;;  %v30_v4 = vld [vmem:[%s1261_s1 + $0x10] sm:$0xff]  ;;  %929 = vmatprep.subr.mxu1 %v1076_v5 }
   0x2   :  { %918 = vmatprep.subr.mxu0 %v31_v1  ;;  %v1103_v3 = vld [vmem:[%s1261_s1 + $0x38] sm:$0xff]  ;;  %17 = vperm.xlu0 %1032, %v12_v0   ;;  %v1112_v6 = vld [vmem:[%s1261_s1 + $0x30] sm:$0xff]  ;;  %v13_v7 = vld [vmem:[%s1260_s0 + $0x8] sm:$0xff] }
   0x3   :  { %919 = vmatpush3.msra.mxu0 %v31_v1  ;;  %930 = vmatpush3.msra.mxu1 %v1103_v3  ;;  %v29_v8 = vld [vmem:[%s1261_s1 + $0x8] sm:$0xff] }
   0x4   :  { %7 = vsyncpa [#allocation3], 0  ;;  %920 = vmatprep.subr.mxu0 %v30_v4  ;;  %931 = vmatprep.subr.mxu1 %v1076_v5  ;;  %v1126_v9 = vld [vmem:[%s1261_s1 + $0x28] sm:$0xff]  ;;  %v28_v10 = vld [vmem:[%s1261_s1] sm:$0xff]  ;;  %vm1077_vm0 = vmmov 0   ;;  %v14_v12 = vlaneseq  ;;  %vm32_vm1 = vcmask 261120  }
   0x5   :  { %921 = vmatpush3.msra.mxu0 %v30_v4  ;;  %932 = vmatpush3.msra.mxu1 %v1112_v6  ;;  %v1135_v11 = vld [vmem:[%s1261_s1 + $0x20] sm:$0xff]  ;;  %v744_v58 = vld [vmem:[%s1261_s1 + $0x58] sm:$0xff]  ;;  %v743_v59 = vld [vmem:[%s1261_s1 + $0x50] sm:$0xff]  ;;  %vm826_vm5 = vcmask 254976   ;;  %s1078_s10 = smov [#allocation2]   ;;  %vm838_vm6 = vcmask 66560  }
   0x6   :  { %20 = vperm.xlu0 %1032, %v13_v7   ;;  %922 = vmatprep.subr.mxu0 %v29_v8  ;;  %v1155_v13 = vand.u32 127, %v14_v12  ;;  %v742_v60 = vld [vmem:[%s1261_s1 + $0x48] sm:$0xff]  ;;  %v741_v61 = vld [vmem:[%s1261_s1 + $0x40] sm:$0xff] }
   0x7   :  { %933 = vmatprep.subr.mxu1 %v1076_v5  ;;  %923 = vmatpush3.msra.mxu0 %v29_v8  ;;  %v865_v4 = vld [vmem:[%s1261_s1 + $0x60] ss:$0 sm:$0xff]  ;;  %s846_s1 = sshll.u32 %s1078_s10, 4  ;;  %s847_s1 = int_to_ptr.vmem [resolvable:$true] %s846_s1 }
   0x8   :  { %934 = vmatpush3.msra.mxu1 %v1126_v9  ;;  %924 = vmatprep.subr.mxu0 %v28_v10  ;;  %vm824_vm4 = vcmp.lt.s32.totalorder %v1155_v13, 9  ;;  %s1053_s11 = scalar_lea.vmem %s847_s1, 32  ;;  %p1058_p1 = scmp.lt.s32.totalorder %s847_s1, %s847_s1 }
   0x9   :  { %935 = vmatprep.subr.mxu1 %v1076_v5  ;;  %925 = vmatpush3.msra.mxu0 %v28_v10  ;;  %p1054_p0 = scmp.ne.s32.totalorder %s847_s1, %s1053_s11  ;;  %p1059_p2 = scmp.lt.s32.totalorder %s1053_s11, %s1053_s11 }
   0xa   :  { %936 = vmatpush3.msra.mxu1 %v1135_v11  ;;  %937 = vmatprep.mubr.msk.f32.mxu1 %vm1077_vm0, %v1076_v5 }
   0xb   :  { %938 = vmatmul.mubr.f32.vlgmr.msra.gmra.mxu1 %v1076_v5  ;;  %940 = vmatprep.subr.mxu0 %v1076_v5  ;;  %p1060_p3 = por %p1059_p2, %p1058_p1 }
   0xc   :  { %951 = vmatprep.subr.mxu1 %v1076_v5  ;;  %959 = vmatprep.mubr.msk.f32.mxu1 %vm1077_vm0, %v1076_v5 }
   0xd   :  { %952 = vmatpush3.msra.mxu1 %v1103_v3  ;;  %p1061_p4 = pnand %p1060_p3, %p1054_p0 }
   0xe   :  { %953 = vmatprep.subr.mxu1 %v1076_v5 }
   0xf   :  { %954 = vmatpush3.msra.mxu1 %v1112_v6 }
  0x10   :  { %955 = vmatprep.subr.mxu1 %v1076_v5 }
  0x11   :  { %956 = vmatpush3.msra.mxu1 %v1126_v9 }
  0x12   :  { %957 = vmatprep.subr.mxu1 %v1076_v5 }
  0x13   :  { %958 = vmatpush3.msra.mxu1 %v1135_v11 }
  0x14   :  { %973 = vmatprep.subr.mxu1 %v1076_v5 }
  0x7d   :  { %v18_v14 = vpop.permute.xlu0 %17 }
  0x7e   :  { %vm22_vm2 = vcmp.eq.s32.totalorder %v18_v14, %v1155_v13 }
  0x7f   :  { %v854_v15 = vsel %vm22_vm2, 1.0, %v1076_v5 }
  0x80   :  { %926 = vmatprep.mubr.msk.f32.mxu0 %vm32_vm1, %v854_v15 }
  0x81   :  { %v21_v16 = vpop.permute.xlu0 %20 }
  0x82   :  { %vm23_vm3 = vcmp.eq.s32.totalorder %v21_v16, %v1155_v13 }
  0x83   :  { %v855_v17 = vsel %vm23_vm3, 1.0, %v1076_v5 }
  0x84   :  { %927 = vmatmul.mubr.msk.f32.vlgmr.msra.gmra.mxu0 %vm32_vm1, %v855_v17 }
  0x85   :  { %941 = vmatpush3.msra.mxu0 %v1103_v3  ;;  %948 = vmatprep.mubr.msk.f32.mxu0 %vm1077_vm0, %v1076_v5 }
  0x86   :  { %942 = vmatprep.subr.mxu0 %v1076_v5 }
  0x87   :  { %943 = vmatpush3.msra.mxu0 %v1112_v6 }
  0x88   :  { %944 = vmatprep.subr.mxu0 %v1076_v5 }
  0x89   :  { %945 = vmatpush3.msra.mxu0 %v1126_v9 }
  0x8a   :  { %946 = vmatprep.subr.mxu0 %v1076_v5 }
  0x8b   :  { %947 = vmatpush3.msra.mxu0 %v1135_v11 }
  0x8c   :  { %962 = vmatprep.subr.mxu0 %v1076_v5 }
  0xcb   :  { %v187_v18 = vpop.f32.mrf.mxu1 }
  0xcd   :  { %v939_v19 = vpop.f32.mrf.mxu1 }
 0x144   :  { %v1173_v20 = vpop.f32.mrf.mxu0 }
 0x146   :  { %v105_v21 = vpop.f32.mrf.mxu0 }
 0x147   :  { %v191_v22 = vadd.f32 %v187_v18, %v105_v21 }
 0x149   :  { %1033 = vtanh.f32 %v191_v22 }
 0x156   :  { %v1034_v23 = vpop.eup %1033 }
 0x157   :  { %949 = vmatmul.mubr.msk.f32.vlgmr.msra.gmra.mxu0 %vm32_vm1, %v1034_v23 }
 0x158   :  { %963 = vmatpush3.msra.mxu0 %v1103_v3  ;;  %970 = vmatprep.mubr.msk.f32.mxu0 %vm1077_vm0, %v1076_v5 }
 0x159   :  { %964 = vmatprep.subr.mxu0 %v1076_v5 }
 0x15a   :  { %965 = vmatpush3.msra.mxu0 %v1112_v6 }
 0x15b   :  { %966 = vmatprep.subr.mxu0 %v1076_v5 }
 0x15c   :  { %967 = vmatpush3.msra.mxu0 %v1126_v9 }
 0x15d   :  { %968 = vmatprep.subr.mxu0 %v1076_v5 }
 0x15e   :  { %969 = vmatpush3.msra.mxu0 %v1135_v11 }
 0x15f   :  { %984 = vmatprep.subr.mxu0 %v1076_v5 }
 0x217   :  { %v262_v24 = vpop.f32.mrf.mxu0 }
 0x218   :  { %v267_v25 = vrot.slane %v262_v24, 6 }
 0x219   :  { %v950_v26 = vpop.f32.mrf.mxu0 }
 0x21a   :  { %v269_v27 = vadd.f32 %v267_v25, %v105_v21 }
 0x21c   :  { %1035 = vtanh.f32 %v269_v27 }
 0x229   :  { %v1036_v28 = vpop.eup %1035 }
 0x22a   :  { %v272_v29 = vrot.slane %v1036_v28, 2 }
 0x22c   :  { %960 = vmatmul.mubr.msk.f32.vlgmr.msra.gmra.mxu1 %vm32_vm1, %v272_v29 }
 0x22d   :  { %974 = vmatpush3.msra.mxu1 %v1103_v3  ;;  %981 = vmatprep.mubr.msk.f32.mxu1 %vm1077_vm0, %v1076_v5 }
 0x22e   :  { %975 = vmatprep.subr.mxu1 %v1076_v5 }
 0x22f   :  { %976 = vmatpush3.msra.mxu1 %v1112_v6 }
 0x230   :  { %977 = vmatprep.subr.mxu1 %v1076_v5 }
 0x231   :  { %978 = vmatpush3.msra.mxu1 %v1126_v9 }
 0x232   :  { %979 = vmatprep.subr.mxu1 %v1076_v5 }
 0x233   :  { %980 = vmatpush3.msra.mxu1 %v1135_v11 }
 0x234   :  { %995 = vmatprep.subr.mxu1 %v1076_v5 }
 0x2ec   :  { %v341_v30 = vpop.f32.mrf.mxu1 }
 0x2ed   :  { %v346_v31 = vrot.slane %v341_v30, 4 }
 0x2ee   :  { %v961_v32 = vpop.f32.mrf.mxu1 }
 0x2ef   :  { %v348_v33 = vadd.f32 %v346_v31, %v105_v21 }
 0x2f1   :  { %1037 = vtanh.f32 %v348_v33 }
 0x2fe   :  { %v1038_v34 = vpop.eup %1037 }
 0x2ff   :  { %v351_v35 = vrot.slane %v1038_v34, 4 }
 0x301   :  { %971 = vmatmul.mubr.msk.f32.vlgmr.msra.gmra.mxu0 %vm32_vm1, %v351_v35 }
 0x302   :  { %985 = vmatpush3.msra.mxu0 %v1103_v3  ;;  %992 = vmatprep.mubr.msk.f32.mxu0 %vm1077_vm0, %v1076_v5 }
 0x303   :  { %986 = vmatprep.subr.mxu0 %v1076_v5 }
 0x304   :  { %987 = vmatpush3.msra.mxu0 %v1112_v6 }
 0x305   :  { %988 = vmatprep.subr.mxu0 %v1076_v5 }
 0x306   :  { %989 = vmatpush3.msra.mxu0 %v1126_v9 }
 0x307   :  { %990 = vmatprep.subr.mxu0 %v1076_v5 }
 0x308   :  { %991 = vmatpush3.msra.mxu0 %v1135_v11 }
 0x309   :  { %1006 = vmatprep.subr.mxu0 %v1076_v5 }
 0x3c1   :  { %v420_v36 = vpop.f32.mrf.mxu0 }
 0x3c2   :  { %v425_v37 = vrot.slane %v420_v36, 2 }
 0x3c3   :  { %v972_v38 = vpop.f32.mrf.mxu0 }
 0x3c4   :  { %v427_v39 = vadd.f32 %v425_v37, %v105_v21 }
 0x3c6   :  { %1039 = vtanh.f32 %v427_v39 }
 0x3d3   :  { %v1040_v40 = vpop.eup %1039 }
 0x3d4   :  { %v430_v41 = vrot.slane %v1040_v40, 6 }
 0x3d6   :  { %982 = vmatmul.mubr.msk.f32.vlgmr.msra.gmra.mxu1 %vm32_vm1, %v430_v41 }
 0x3d7   :  { %996 = vmatpush3.msra.mxu1 %v1103_v3  ;;  %1003 = vmatprep.mubr.msk.f32.mxu1 %vm1077_vm0, %v1076_v5 }
 0x3d8   :  { %997 = vmatprep.subr.mxu1 %v1076_v5 }
 0x3d9   :  { %998 = vmatpush3.msra.mxu1 %v1112_v6 }
 0x3da   :  { %999 = vmatprep.subr.mxu1 %v1076_v5 }
 0x3db   :  { %1000 = vmatpush3.msra.mxu1 %v1126_v9 }
 0x3dc   :  { %1001 = vmatprep.subr.mxu1 %v1076_v5 }
 0x3dd   :  { %1002 = vmatpush3.msra.mxu1 %v1135_v11 }
 0x3de   :  { %1017 = vmatprep.subr.mxu1 %v1076_v5 }
 0x496   :  { %v499_v42 = vpop.f32.mrf.mxu1 }
 0x497   :  { %v503_v43 = vadd.f32 %v1173_v20, %v499_v42 }
 0x498   :  { %v983_v44 = vpop.f32.mrf.mxu1 }
 0x499   :  { %1041 = vtanh.f32 %v503_v43 }
 0x4a6   :  { %v1042_v45 = vpop.eup %1041 }
 0x4a7   :  { %993 = vmatmul.mubr.msk.f32.vlgmr.msra.gmra.mxu0 %vm32_vm1, %v1042_v45 }
 0x4a8   :  { %1007 = vmatpush3.msra.mxu0 %v1103_v3  ;;  %1014 = vmatprep.mubr.msk.f32.mxu0 %vm1077_vm0, %v1076_v5 }
 0x4a9   :  { %1008 = vmatprep.subr.mxu0 %v1076_v5 }
 0x4aa   :  { %1009 = vmatpush3.msra.mxu0 %v1112_v6 }
 0x4ab   :  { %1010 = vmatprep.subr.mxu0 %v1076_v5 }
 0x4ac   :  { %1011 = vmatpush3.msra.mxu0 %v1126_v9 }
 0x4ad   :  { %1012 = vmatprep.subr.mxu0 %v1076_v5 }
 0x4ae   :  { %1013 = vmatpush3.msra.mxu0 %v1135_v11 }
 0x567   :  { %v574_v46 = vpop.f32.mrf.mxu0 }
 0x568   :  { %v579_v47 = vrot.slane %v574_v46, 6 }
 0x569   :  { %v994_v48 = vpop.f32.mrf.mxu0 }
 0x56a   :  { %v581_v49 = vadd.f32 %v1173_v20, %v579_v47 }
 0x56c   :  { %1043 = vtanh.f32 %v581_v49 }
 0x579   :  { %v1044_v50 = vpop.eup %1043 }
 0x57a   :  { %v584_v51 = vrot.slane %v1044_v50, 2 }
 0x57c   :  { %1004 = vmatmul.mubr.msk.f32.vlgmr.msra.gmra.mxu1 %vm32_vm1, %v584_v51 }
 0x57d   :  { %1025 = vmatprep.mubr.msk.f32.mxu1 %vm1077_vm0, %v1076_v5  ;;  %1018 = vmatpush3.msra.mxu1 %v744_v58 }
 0x57e   :  { %1019 = vmatprep.subr.mxu1 %v1076_v5 }
 0x57f   :  { %1020 = vmatpush3.msra.mxu1 %v743_v59 }
 0x580   :  { %1021 = vmatprep.subr.mxu1 %v1076_v5 }
 0x581   :  { %1022 = vmatpush3.msra.mxu1 %v742_v60 }
 0x582   :  { %1023 = vmatprep.subr.mxu1 %v1076_v5 }
 0x583   :  { %1024 = vmatpush3.msra.mxu1 %v741_v61 }
 0x63c   :  { %v653_v52 = vpop.f32.mrf.mxu1 }
 0x63d   :  { %v658_v53 = vrot.slane %v653_v52, 4 }
 0x63e   :  { %v1005_v54 = vpop.f32.mrf.mxu1 }
 0x63f   :  { %v660_v55 = vadd.f32 %v1173_v20, %v658_v53 }
 0x641   :  { %1045 = vtanh.f32 %v660_v55 }
 0x64e   :  { %v1046_v56 = vpop.eup %1045 }
 0x64f   :  { %v663_v57 = vrot.slane %v1046_v56, 4 }
 0x651   :  { %1015 = vmatmul.mubr.msk.f32.vlgmr.msra.gmra.mxu0 %vm32_vm1, %v663_v57 }
 0x711   :  { %v732_v62 = vpop.f32.mrf.mxu0 }
 0x712   :  { %v737_v63 = vrot.slane %v732_v62, 2 }
 0x713   :  { %v1016_v0 = vpop.f32.mrf.mxu0 }
 0x714   :  { %v739_v1 = vadd.f32 %v1173_v20, %v737_v63 }
 0x716   :  { %1047 = vtanh.f32 %v739_v1 }
 0x723   :  { %v1048_v2 = vpop.eup %1047 }
 0x724   :  { %v751_v3 = vrot.slane %v1048_v2, 6 }
 0x726   :  { %1026 = vmatmul.mubr.msk.f32.vlgmr.msra.gmra.mxu1 %vm32_vm1, %v751_v3 }
 0x7e6   :  { %v820_v5 = vpop.f32.mrf.mxu1 }
 0x7e7   :  { %v821_v6 = vadd.f32 %v865_v4, %v820_v5 }
 0x7e8   :  { %v1027_v7 = vpop.f32.mrf.mxu1 }
 0x7e9   :  { %v825_v8 = vsel %vm824_vm4, %v821_v6, -1e+30 }
 0x7ea   :  { %v827_v9 = vsel %vm826_vm5, %v825_v8, -inf }
 0x7eb   :  { %828 = vmax.xlane.f32.xlu1 %v827_v9 }
 0x874   :  { %v829_v10 = vpop.xlane.xlu1 %828 }
 0x875   :  { %v830_v11 = vsub.f32 %v825_v8, %v829_v10 }
 0x877   :  { %v831_v12 = vmul.f32 1.442695, %v830_v11 }
 0x879   :  { %1049 = vpow2.f32 %v831_v12 }
 0x886   :  { %v1050_v14 = vpop.eup %1049 }
 0x887   :  { %v833_v15 = vsel %vm826_vm5, %v1050_v14, 0.0 }
 0x888   :  { %834 = vadd.xlane.f32.xlu1 %v833_v15 }
 0x911   :  { %v835_v16 = vpop.xlane.xlu1 %834 }
 0x912   :  { %1051 = vrcp.f32 %v835_v16 }
 0x91f   :  { %v1052_v17 = vpop.eup %1051 }
 0x920   :  { %v837_v13 = vmul.f32 %v1052_v17, %v1050_v14 }
 0x922   :  { %839 = vst.msk [vmem:[#allocation2] sm:$0x3] %vm838_vm6, %v837_v13 }
 0x923   :  { %1064 = shalt.err (!%p1061_p4)
}
 0x924   :  { %849 = dma.vmem_to_hbm [thread:$0]  %s847_s1, 32, %s1262_s2, [#allocation3]  }
 0x925   :  { %1073 = dma.done.wait [#allocation3], 32  }
 0x926   :  { %1074 = vsyncadd [#allocation3], 4294967264 }
 0x927   :  { %853 = vsyncpa [#allocation3], 1 }

</bundles_post_ra>
